<compile_context>
chip_gen: v7x
topology: tpu7x:2x2x1
jax: 0.10.0
libtpu: 0.0.40
codegen_flags: <defaults>
</compile_context>

<pallas_src>
import jax
import jax.numpy as jnp
from jax.experimental import pallas as pl
from jax.experimental.pallas import tpu as pltpu


def _scaled_tanh_kernel(scale_ref, x_ref, o_ref):
    # EUP tanh + VPU multiply; compute in f32, single cast on the store.
    x = x_ref[...].astype(jnp.float32)
    o_ref[...] = (jnp.tanh(x) * scale_ref[0]).astype(o_ref.dtype)


def _round_up(a, b):
    return ((a + b - 1) // b) * b


def _choose_width(n, max_width=4096):
    """Largest lane-dense width (multiple of 128, <= max_width) dividing n."""
    w = (max_width // 128) * 128
    while w >= 128:
        if n % w == 0:
            return w
        w -= 128
    return None


def scaled_tanh(x, scaling, *, target_tile_bytes=2 * 1024 * 1024,
                small_input_bytes=1 << 20):
    """y = tanh(x) * scaling via a Pallas TPU kernel. Works for any shape."""
    orig_shape = x.shape
    n = x.size
    itemsize = jnp.dtype(x.dtype).itemsize

    width = _choose_width(n)
    # Small-input fast path / non-128-divisible fallback: fused XLA elementwise
    # (semantically identical; avoids launch overhead and wrapper copies).
    if width is None or n * itemsize < small_input_bytes:
        return (jnp.tanh(x.astype(jnp.float32)) * jnp.float32(scaling)).astype(x.dtype)

    rows = n // width
    x2d = x.reshape(rows, width)          # contiguous reshape: free (metadata only)

    # ~target_tile_bytes per block; row count a multiple of 8 (or the full dim).
    max_rows = max(8, (target_tile_bytes // (width * itemsize)) // 8 * 8)
    block_rows = rows if rows <= max_rows else max_rows
    grid = pl.cdiv(rows, block_rows)

    # Keep >= 2 grid programs when possible so "parallel" can use both
    # TensorCores on v7x (megacore); harmless on v5e/v6e.
    if grid < 2 and rows >= 16:
        block_rows = _round_up(pl.cdiv(rows, 2), 8)
        grid = pl.cdiv(rows, block_rows)

    scale = jnp.asarray([scaling], dtype=jnp.float32)

    out2d = pl.pallas_call(
        _scaled_tanh_kernel,
        out_shape=jax.ShapeDtypeStruct((rows, width), x.dtype),
        grid=(grid,),
        in_specs=[
            pl.BlockSpec(memory_space=pltpu.MemorySpace.SMEM),     # scaling scalar
            pl.BlockSpec((block_rows, width), lambda i: (i, 0)),   # streamed input
        ],
        out_specs=pl.BlockSpec((block_rows, width), lambda i: (i, 0)),
        compiler_params=pltpu.CompilerParams(
            dimension_semantics=("parallel",),
        ),
    )(scale, x2d)

    return out2d.reshape(orig_shape)      # free reshape back (no slice, no copy)


if __name__ == "__main__":
    key = jax.random.PRNGKey(0)
    scaling = 2.5  # deterministic constructor arg of the module

    # Small NCHW activation, as PyTorch would feed it: batch=2, channels=4, 16x16.
    x_small = jax.random.normal(key, (2, 4, 16, 16), dtype=jnp.float32)

    # Force the Pallas path even for this tiny tensor so the kernel itself runs.
    y_small = jax.block_until_ready(scaled_tanh(x_small, scaling, small_input_bytes=0))
    ref_small = jnp.tanh(x_small) * scaling
    assert y_small.shape == x_small.shape and y_small.dtype == x_small.dtype
    assert jnp.allclose(y_small, ref_small, atol=1e-6, rtol=1e-6)

    # Larger tensor exercising the tiled, multi-program (megacore-friendly) path.
    x_big = jax.random.normal(jax.random.PRNGKey(0), (2, 64, 64, 64), dtype=jnp.float32)
    y_big = jax.block_until_ready(scaled_tanh(x_big, scaling))
    ref_big = jnp.tanh(x_big) * scaling
    assert y_big.shape == x_big.shape and y_big.dtype == x_big.dtype
    assert jnp.allclose(y_big, ref_big, atol=1e-6, rtol=1e-6)

    # bf16 path: f32 compute inside the kernel, single cast on store.
    x_bf16 = jax.random.normal(jax.random.PRNGKey(0), (2, 4, 16, 16), jnp.float32).astype(jnp.bfloat16)
    y_bf16 = jax.block_until_ready(scaled_tanh(x_bf16, scaling, small_input_bytes=0))
    ref_bf16 = (jnp.tanh(x_bf16.astype(jnp.float32)) * scaling).astype(jnp.bfloat16)
    assert y_bf16.dtype == jnp.bfloat16
    assert jnp.allclose(y_bf16.astype(jnp.float32), ref_bf16.astype(jnp.float32),
                        atol=1e-2, rtol=1e-2)

    print("KERNEL_OK")
</pallas_src>

<mosaic_0001>
module attributes {stable_mosaic.version = 11 : i64} {
  func.func @_scaled_tanh_kernel(%arg0: i32, %arg1: memref<1xf32, #tpu.memory_space<smem>>, %arg2: memref<1x2048xf32, #tpu.memory_space<vmem>>, %arg3: memref<1x2048xf32, #tpu.memory_space<vmem>>) attributes {dimension_semantics = [#tpu.dimension_semantics<parallel>], iteration_bounds = array<i64: 1>, scalar_prefetch = 0 : i64, scratch_operands = 0 : i64, tpu.core_type = #tpu.core_type<tc>, window_params = [{transform_indices = @transform_0, window_bounds = array<i64: 1>}, {transform_indices = @transform_1, window_bounds = array<i64: 1, 2048>}, {transform_indices = @transform_2, window_bounds = array<i64: 1, 2048>}]} {
    %c0 = arith.constant 0 : index
    %c0_0 = arith.constant 0 : index
    %0 = vector.load %arg2[%c0, %c0_0] : memref<1x2048xf32, #tpu.memory_space<vmem>>, vector<1x2048xf32>
    %1 = math.tanh %0 : vector<1x2048xf32>
    %c0_1 = arith.constant 0 : index
    %2 = memref.load %arg1[%c0_1] : memref<1xf32, #tpu.memory_space<smem>>
    %3 = vector.broadcast %2 : f32 to vector<1x2048xf32>
    %4 = arith.mulf %1, %3 : vector<1x2048xf32>
    %c0_2 = arith.constant 0 : index
    %c0_3 = arith.constant 0 : index
    %5 = vector.load %arg3[%c0_2, %c0_3] : memref<1x2048xf32, #tpu.memory_space<vmem>>, vector<1x2048xf32>
    tpu.vector_store %arg3[%c0_2, %c0_3], %4 {strides = array<i32>} : memref<1x2048xf32, #tpu.memory_space<vmem>>, vector<1x2048xf32>,
    return
  }
  func.func @transform_0(%arg0: i32) -> i32 {
    %c0_i32 = arith.constant 0 : i32
    %c0_i32_0 = arith.constant 0 : i32
    return %c0_i32 : i32
  }
  func.func @transform_1(%arg0: i32) -> (i32, i32) {
    %c0_i32 = arith.constant 0 : i32
    %c0_i32_0 = arith.constant 0 : i32
    return %arg0, %c0_i32 : i32, i32
  }
  func.func @transform_2(%arg0: i32) -> (i32, i32) {
    %c0_i32 = arith.constant 0 : i32
    %c0_i32_0 = arith.constant 0 : i32
    return %arg0, %c0_i32 : i32, i32
  }
}

</mosaic_0001>

<bundles_post_ra>
// kernel: tpu_custom_call.1
= control target key start
LH: loop header
LB: loop body
LE: loop exit
PB: predicated region body
PF: predicated region fallthrough
CT: control target
= control target key end

     0   :  { %8 = vsyncpa [#allocation4], 0  ;;  %s148_s0 = inlined_call_operand.<no memory space> [shape: f32[1], index: 0, kind: input, shape index: {}]   ;;  %s149_s1 = inlined_call_operand.hbm [shape: f32[1,2048], index: 1, kind: input, shape index: {}]   ;;  %s150_s2 = inlined_call_operand.hbm [shape: f32[1,2048], index: 2, kind: output, shape index: {}]  }
   0x1   :  { %9 = vsyncpa [#allocation5], 0  ;;  %s104_s9 = smov [#allocation3]   ;;  %s56_s13 = scalar_lea.hbm %s149_s1, 256 }
   0x2   :  { %s18_s10 = sshll.u32 %s104_s9, 4  ;;  %p57_p0 = scmp.ne.s32.totalorder %s149_s1, %s56_s13  ;;  %s19_s10 = int_to_ptr.vmem [resolvable:$true] %s18_s10 }
   0x3   :  { %p60_p1 = scmp.lt.u32.totalorder %s56_s13, %s149_s1 }
   0x5   :  { %p62_p2 = pnand %p60_p1, %p57_p0 }
   0x7   :  { %65 = shalt.err (!%p62_p2)
}
   0x8   :  { %s66_s18 = scalar_lea.vmem %s19_s10, 256  ;;  %p71_p4 = scmp.lt.s32.totalorder %s19_s10, %s19_s10 }
   0x9   :  { %p67_p3 = scmp.ne.s32.totalorder %s19_s10, %s66_s18  ;;  %p72_p5 = scmp.lt.s32.totalorder %s66_s18, %s66_s18 }
   0xb   :  { %p73_p6 = por %p72_p5, %p71_p4 }
   0xd   :  { %p74_p7 = pnand %p73_p6, %p67_p3 }
   0xf   :  { %77 = shalt.err (!%p74_p7)
}
  0x10   :  { %21 = dma.hbm_to_vmem [thread:$0]  %s149_s1, 256, %s19_s10, [#allocation4]  }
  0x11   :  { %100 = dma.done.wait [#allocation4], 256  }
  0x12   :  { %101 = vsyncadd [#allocation4], 4294967040  ;;  %v25_v0 = vld [vmem:[#allocation3] sm:$0xff]  ;;  %v26_v1 = vld [vmem:[#allocation3 + $0x8] sm:$0xff]  ;;  %v30_v2 = vstv %s148_s0  ;;  %s105_s23 = smov [#allocation6]  }
  0x13   :  { %52 = vtanh.f32 %v25_v0  ;;  %s41_s24 = sshll.u32 %s105_s23, 4  ;;  %s42_s24 = int_to_ptr.vmem [resolvable:$true] %s41_s24 }
  0x14   :  { %54 = vtanh.f32 %v26_v1  ;;  %s78_s1 = scalar_lea.vmem %s42_s24, 256  ;;  %p83_p9 = scmp.lt.s32.totalorder %s42_s24, %s42_s24 }
  0x15   :  { %p79_p8 = scmp.ne.s32.totalorder %s42_s24, %s78_s1  ;;  %p84_p10 = scmp.lt.s32.totalorder %s78_s1, %s78_s1 }
  0x17   :  { %p85_p11 = por %p84_p10, %p83_p9 }
  0x19   :  { %p86_p12 = pnand %p85_p11, %p79_p8 }
  0x1d   :  { %v53_v3 = vpop.eup %52 }
  0x1e   :  { %v55_v4 = vpop.eup %54  ;;  %v31_v5 = vmul.f32 %v53_v3, %v30_v2 }
  0x1f   :  { %v32_v6 = vmul.f32 %v55_v4, %v30_v2 }
  0x20   :  { %33 = vst [vmem:[#allocation6] sm:$0xff] %v31_v5 }
  0x21   :  { %34 = vst [vmem:[#allocation6 + $0x8] sm:$0xff] %v32_v6 }
  0x22   :  { %89 = shalt.err (!%p86_p12)
}
  0x23   :  { %s90_s0 = scalar_lea.hbm %s150_s2, 256 }
  0x24   :  { %p91_p13 = scmp.ne.s32.totalorder %s150_s2, %s90_s0  ;;  %p94_p0 = scmp.lt.u32.totalorder %s90_s0, %s150_s2 }
  0x26   :  { %p96_p1 = pnand %p94_p0, %p91_p13 }
  0x28   :  { %99 = shalt.err (!%p96_p1)
}
  0x29   :  { %44 = dma.vmem_to_hbm [thread:$0]  %s42_s24, 256, %s150_s2, [#allocation5]  }
  0x2a   :  { %102 = dma.done.wait [#allocation5], 256  }
  0x2b   :  { %103 = vsyncadd [#allocation5], 4294967040 }
  0x2c   :  { %48 = vsyncpa [#allocation4], 1 }
  0x2d   :  { %49 = vsyncpa [#allocation5], 1 }

</bundles_post_ra>
